<compile_context>
chip_gen: v7x
topology: tpu7x:2x2x1
jax: 0.10.0
libtpu: 0.0.40
codegen_flags: <defaults>
</compile_context>

<pallas_src>
import functools

import jax
import jax.numpy as jnp
from jax import lax
from jax.experimental import pallas as pl
from jax.experimental.pallas import tpu as pltpu


def _self_attention_kernel(gamma_ref, x_ref, wqkv_ref, wo_ref, out_ref, attn_ref,
                           *, n, c, c8, hw):
    """Single grid step over the full (tiny) batch.

    gamma_ref: (1, 1) SMEM scalar
    x_ref:     (C+1, N*HW)  -- last row is all-ones (bias channel)
    wqkv_ref:  (2*c8 + C, C+1) -- [wq; wk; wv] with biases as last column
    wo_ref:    (C, C+1)     -- wo with bo as last column
    out_ref:   (C, N*HW)
    attn_ref:  (HW, N*HW)   -- per-batch (HW, HW) attention maps, concatenated on lanes
    """
    gamma = gamma_ref[0, 0]
    x_aug = x_ref[...]                      # (C+1, N*HW)
    wqkv = wqkv_ref[...]                    # (2*c8+C, C+1)
    wo_full = wo_ref[...]                   # (C, C+1)
    wo = wo_full[:, :c]                     # (C, C)
    bo = wo_full[:, c:c + 1]                # (C, 1)

    # Fused query/key/value 1x1 convolutions (biases folded via the ones channel):
    # a single MXU matmul over the whole batch.
    qkv = jnp.dot(wqkv, x_aug, preferred_element_type=jnp.float32)   # (2*c8+C, N*HW)
    q = qkv[:c8]                            # (c8, N*HW)
    k = qkv[c8:2 * c8]                      # (c8, N*HW)
    v = qkv[2 * c8:2 * c8 + c]              # (C,  N*HW)
    x = x_aug[:c, :]                        # original input, (C, N*HW)

    outs = []
    attns = []
    for b in range(n):                      # static unroll; N is tiny
        sl = slice(b * hw, (b + 1) * hw)
        qb, kb, vb, xb = q[:, sl], k[:, sl], v[:, sl], x[:, sl]

        # energy = q^T @ k: contract the channel axis directly (no materialized transpose).
        energy = lax.dot_general(qb, kb, (((0,), (0,)), ((), ())),
                                 preferred_element_type=jnp.float32)  # (HW, HW)
        energy = energy - jnp.max(energy, axis=-1, keepdims=True)
        p = jnp.exp(energy)
        attn = p * pl.reciprocal(jnp.sum(p, axis=-1, keepdims=True), approx=True)

        # torch.bmm(attn_map, value): (HW, HW) @ (C, HW) -- valid only because C == HW;
        # reproduced verbatim (this is the module's own convention).
        av = jnp.dot(attn, vb, preferred_element_type=jnp.float32)    # (C, HW)
        safm = jnp.dot(wo, av, preferred_element_type=jnp.float32) + bo

        outs.append(xb + gamma * safm)
        attns.append(attn)

    out_ref[...] = jnp.concatenate(outs, axis=1)     # one full-block store, (C, N*HW)
    attn_ref[...] = jnp.concatenate(attns, axis=1)   # one full-block store, (HW, N*HW)


def self_attention_pallas(x_nchw, params):
    """x_nchw: (N, C, H, W) float32.  Returns (out (N,C,H,W), attn (N, HW, HW))."""
    n, c, h, w = x_nchw.shape
    hw = h * w
    # The original module's torch.bmm(attn_map, value) only type-checks when C == H*W.
    assert c == hw, "SelfAttention requires in_channels == H*W (module's bmm convention)"
    c8 = params["wq"].shape[0]

    # (N, C, H, W) -> (C, N*HW), plus a ones row (bias channel).  Wrapper-side layout only.
    x2d = x_nchw.reshape(n, c, hw).transpose(1, 0, 2).reshape(c, n * hw).astype(jnp.float32)
    x_aug = jnp.concatenate([x2d, jnp.ones((1, n * hw), jnp.float32)], axis=0)  # (C+1, N*HW)

    # Fused QKV weight, biases folded as the last column.
    wqkv = jnp.concatenate([
        jnp.concatenate([params["wq"], params["bq"][:, None]], axis=1),
        jnp.concatenate([params["wk"], params["bk"][:, None]], axis=1),
        jnp.concatenate([params["wv"], params["bv"][:, None]], axis=1),
    ], axis=0).astype(jnp.float32)                                              # (2*c8+C, C+1)

    wo_full = jnp.concatenate([params["wo"], params["bo"][:, None]],
                              axis=1).astype(jnp.float32)                       # (C, C+1)

    gamma = params["gamma"].reshape(1, 1).astype(jnp.float32)

    kernel = functools.partial(_self_attention_kernel, n=n, c=c, c8=c8, hw=hw)

    out2d, attn2d = pl.pallas_call(
        kernel,
        grid=(1,),
        in_specs=[
            pl.BlockSpec((1, 1), lambda i: (0, 0), memory_space=pltpu.SMEM),   # gamma
            pl.BlockSpec((c + 1, n * hw), lambda i: (0, 0)),                   # x (augmented)
            pl.BlockSpec((2 * c8 + c, c + 1), lambda i: (0, 0)),               # fused QKV weight
            pl.BlockSpec((c, c + 1), lambda i: (0, 0)),                        # output weight + bias
        ],
        out_specs=[
            pl.BlockSpec((c, n * hw), lambda i: (0, 0)),
            pl.BlockSpec((hw, n * hw), lambda i: (0, 0)),
        ],
        out_shape=[
            jax.ShapeDtypeStruct((c, n * hw), jnp.float32),
            jax.ShapeDtypeStruct((hw, n * hw), jnp.float32),
        ],
        compiler_params=pltpu.CompilerParams(dimension_semantics=("arbitrary",)),
    )(gamma, x_aug, wqkv, wo_full)

    out = out2d.reshape(c, n, hw).transpose(1, 0, 2).reshape(n, c, h, w)
    attn = attn2d.reshape(hw, n, hw).transpose(1, 0, 2)                        # (N, HW, HW)
    return out, attn


# ---------------- parameter setup (plain JAX glue) ----------------

def _spectral_normalize(wmat):
    """Divide weight by its largest singular value (what nn.utils.spectral_norm
    converges to; deterministic stand-in for PyTorch's power iteration)."""
    sigma = jnp.linalg.svd(wmat, compute_uv=False)[0]
    return wmat / sigma


def init_params(key, in_channels):
    c = in_channels
    c8 = c // 8
    ks = jax.random.split(key, 8)
    scale = 0.1
    return {
        "wq": _spectral_normalize(scale * jax.random.normal(ks[0], (c8, c), jnp.float32)),
        "bq": scale * jax.random.normal(ks[1], (c8,), jnp.float32),
        "wk": _spectral_normalize(scale * jax.random.normal(ks[2], (c8, c), jnp.float32)),
        "bk": scale * jax.random.normal(ks[3], (c8,), jnp.float32),
        "wv": _spectral_normalize(scale * jax.random.normal(ks[4], (c, c), jnp.float32)),
        "bv": scale * jax.random.normal(ks[5], (c,), jnp.float32),
        "wo": _spectral_normalize(scale * jax.random.normal(ks[6], (c, c), jnp.float32)),
        "bo": scale * jax.random.normal(ks[7], (c,), jnp.float32),
        # PyTorch module initializes gamma to zero.
        "gamma": jnp.zeros((1,), jnp.float32),
    }


# ---------------- pure-JAX reference for verification ----------------

def self_attention_ref(x_nchw, params):
    n, c, h, w = x_nchw.shape
    hw = h * w
    xf = x_nchw.reshape(n, c, hw)
    conv = lambda wmat, b: jnp.einsum("oc,nch->noh", wmat, xf) + b[None, :, None]
    q = conv(params["wq"], params["bq"])                      # (n, c8, hw)
    k = conv(params["wk"], params["bk"])                      # (n, c8, hw)
    v = conv(params["wv"], params["bv"])                      # (n, c,  hw)
    energy = jnp.einsum("ncq,nck->nqk", q, k)                 # (n, hw, hw)
    attn = jax.nn.softmax(energy, axis=-1)
    av = jnp.einsum("nqk,nkh->nqh", attn, v)                  # (n, hw, hw) == (n, c, hw)
    safm = jnp.einsum("oc,nch->noh", params["wo"], av) + params["bo"][None, :, None]
    out = xf + params["gamma"][0] * safm
    return out.reshape(n, c, h, w), attn


if __name__ == "__main__":
    key = jax.random.PRNGKey(0)
    k_x, k_p = jax.random.split(key)

    N, C, H, W = 2, 16, 4, 4          # C == H*W, required by the module's bmm
    x = jax.random.normal(k_x, (N, C, H, W), jnp.float32)
    params = init_params(k_p, C)

    out, attn = self_attention_pallas(x, params)
    out = jax.block_until_ready(out)
    attn = jax.block_until_ready(attn)

    # Verify against pure-JAX reference (tolerance relaxed for pl.reciprocal(approx=True)).
    out_ref, attn_ref = self_attention_ref(x, params)
    assert jnp.allclose(out, out_ref, atol=2e-3, rtol=2e-3)
    assert jnp.allclose(attn, attn_ref, atol=2e-3, rtol=2e-3)

    # Exercise the residual path with nonzero gamma.
    params_g = dict(params, gamma=jnp.array([0.37], jnp.float32))
    out2, _ = self_attention_pallas(x, params_g)
    out2_ref, _ = self_attention_ref(x, params_g)
    assert jnp.allclose(jax.block_until_ready(out2), out2_ref, atol=2e-3, rtol=2e-3)

    print("KERNEL_OK")
</pallas_src>

<mosaic_0001>
module attributes {stable_mosaic.version = 11 : i64} {
  func.func @_self_attention_kernel(%arg0: i32, %arg1: memref<1x1xf32, #tpu.memory_space<smem>>, %arg2: memref<17x32xf32, #tpu.memory_space<vmem>>, %arg3: memref<20x17xf32, #tpu.memory_space<vmem>>, %arg4: memref<16x17xf32, #tpu.memory_space<vmem>>, %arg5: memref<16x32xf32, #tpu.memory_space<vmem>>, %arg6: memref<16x32xf32, #tpu.memory_space<vmem>>) attributes {dimension_semantics = [#tpu.dimension_semantics<arbitrary>], iteration_bounds = array<i64: 1>, scalar_prefetch = 0 : i64, scratch_operands = 0 : i64, tpu.core_type = #tpu.core_type<tc>, window_params = [{transform_indices = @transform_0, window_bounds = array<i64: 1, 1>}, {pipeline_mode = #tpu.pipeline_mode<synchronous>, transform_indices = @transform_1, window_bounds = array<i64: 17, 32>}, {pipeline_mode = #tpu.pipeline_mode<synchronous>, transform_indices = @transform_2, window_bounds = array<i64: 20, 17>}, {pipeline_mode = #tpu.pipeline_mode<synchronous>, transform_indices = @transform_3, window_bounds = array<i64: 16, 17>}, {pipeline_mode = #tpu.pipeline_mode<synchronous>, transform_indices = @transform_4, window_bounds = array<i64: 16, 32>}, {pipeline_mode = #tpu.pipeline_mode<synchronous>, transform_indices = @transform_5, window_bounds = array<i64: 16, 32>}]} {
    %c0 = arith.constant 0 : index
    %c0_0 = arith.constant 0 : index
    %0 = memref.load %arg1[%c0, %c0_0] : memref<1x1xf32, #tpu.memory_space<smem>>
    %c0_1 = arith.constant 0 : index
    %c0_2 = arith.constant 0 : index
    %1 = vector.load %arg2[%c0_1, %c0_2] : memref<17x32xf32, #tpu.memory_space<vmem>>, vector<17x32xf32>
    %c0_3 = arith.constant 0 : index
    %c0_4 = arith.constant 0 : index
    %2 = vector.load %arg3[%c0_3, %c0_4] : memref<20x17xf32, #tpu.memory_space<vmem>>, vector<20x17xf32>
    %c0_5 = arith.constant 0 : index
    %c0_6 = arith.constant 0 : index
    %3 = vector.load %arg4[%c0_5, %c0_6] : memref<16x17xf32, #tpu.memory_space<vmem>>, vector<16x17xf32>
    %4 = vector.extract_strided_slice %3 {offsets = [0, 0], sizes = [16, 16], strides = [1, 1]} : vector<16x17xf32> to vector<16x16xf32>
    %5 = vector.extract_strided_slice %3 {offsets = [0, 16], sizes = [16, 1], strides = [1, 1]} : vector<16x17xf32> to vector<16x1xf32>
    %cst = arith.constant dense<0.000000e+00> : vector<20x32xf32>
    %6 = tpu.matmul %2, %1, %cst {dimension_numbers = #tpu.dot_dimension_numbers<[1], [0], [0], [1], [0, 0, 1, 1], [], []>} : vector<20x17xf32>, vector<17x32xf32>, vector<20x32xf32> -> vector<20x32xf32>
    %7 = vector.extract_strided_slice %6 {offsets = [0, 0], sizes = [2, 32], strides = [1, 1]} : vector<20x32xf32> to vector<2x32xf32>
    %8 = vector.extract_strided_slice %6 {offsets = [2, 0], sizes = [2, 32], strides = [1, 1]} : vector<20x32xf32> to vector<2x32xf32>
    %9 = vector.extract_strided_slice %6 {offsets = [4, 0], sizes = [16, 32], strides = [1, 1]} : vector<20x32xf32> to vector<16x32xf32>
    %10 = vector.extract_strided_slice %1 {offsets = [0, 0], sizes = [16, 32], strides = [1, 1]} : vector<17x32xf32> to vector<16x32xf32>
    %11 = vector.extract_strided_slice %7 {offsets = [0, 0], sizes = [2, 16], strides = [1, 1]} : vector<2x32xf32> to vector<2x16xf32>
    %12 = vector.extract_strided_slice %8 {offsets = [0, 0], sizes = [2, 16], strides = [1, 1]} : vector<2x32xf32> to vector<2x16xf32>
    %13 = vector.extract_strided_slice %9 {offsets = [0, 0], sizes = [16, 16], strides = [1, 1]} : vector<16x32xf32> to vector<16x16xf32>
    %14 = vector.extract_strided_slice %10 {offsets = [0, 0], sizes = [16, 16], strides = [1, 1]} : vector<16x32xf32> to vector<16x16xf32>
    %cst_7 = arith.constant dense<0.000000e+00> : vector<16x16xf32>
    %15 = tpu.matmul %11, %12, %cst_7 {dimension_numbers = #tpu.dot_dimension_numbers<[0], [0], [1], [1], [0, 1, 1, 1], [], []>} : vector<2x16xf32>, vector<2x16xf32>, vector<16x16xf32> -> vector<16x16xf32>
    %cst_8 = arith.constant dense<0xFF800000> : vector<16xf32>
    %16 = vector.multi_reduction <maximumf>, %15, %cst_8 [1] : vector<16x16xf32> to vector<16xf32>
    %17 = vector.shape_cast %16 : vector<16xf32> to vector<16x1xf32>
    %18 = vector.broadcast %17 : vector<16x1xf32> to vector<16x16xf32>
    %19 = arith.subf %15, %18 : vector<16x16xf32>
    %20 = math.exp %19 : vector<16x16xf32>
    %cst_9 = arith.constant dense<0.000000e+00> : vector<16xf32>
    %21 = vector.multi_reduction <add>, %20, %cst_9 [1] : vector<16x16xf32> to vector<16xf32>
    %22 = vector.shape_cast %21 : vector<16xf32> to vector<16x1xf32>
    %23 = tpu.reciprocal %22 {approx = true} : vector<16x1xf32> -> vector<16x1xf32>
    %24 = vector.broadcast %23 : vector<16x1xf32> to vector<16x16xf32>
    %25 = arith.mulf %20, %24 : vector<16x16xf32>
    %cst_10 = arith.constant dense<0.000000e+00> : vector<16x16xf32>
    %26 = tpu.matmul %25, %13, %cst_10 {dimension_numbers = #tpu.dot_dimension_numbers<[1], [0], [0], [1], [0, 0, 1, 1], [], []>} : vector<16x16xf32>, vector<16x16xf32>, vector<16x16xf32> -> vector<16x16xf32>
    %cst_11 = arith.constant dense<0.000000e+00> : vector<16x16xf32>
    %27 = tpu.matmul %4, %26, %cst_11 {dimension_numbers = #tpu.dot_dimension_numbers<[1], [0], [0], [1], [0, 0, 1, 1], [], []>} : vector<16x16xf32>, vector<16x16xf32>, vector<16x16xf32> -> vector<16x16xf32>
    %28 = vector.broadcast %5 : vector<16x1xf32> to vector<16x16xf32>
    %29 = arith.addf %27, %28 : vector<16x16xf32>
    %30 = vector.broadcast %0 : f32 to vector<16x16xf32>
    %31 = arith.mulf %30, %29 : vector<16x16xf32>
    %32 = arith.addf %14, %31 : vector<16x16xf32>
    %33 = vector.extract_strided_slice %7 {offsets = [0, 16], sizes = [2, 16], strides = [1, 1]} : vector<2x32xf32> to vector<2x16xf32>
    %34 = vector.extract_strided_slice %8 {offsets = [0, 16], sizes = [2, 16], strides = [1, 1]} : vector<2x32xf32> to vector<2x16xf32>
    %35 = vector.extract_strided_slice %9 {offsets = [0, 16], sizes = [16, 16], strides = [1, 1]} : vector<16x32xf32> to vector<16x16xf32>
    %36 = vector.extract_strided_slice %10 {offsets = [0, 16], sizes = [16, 16], strides = [1, 1]} : vector<16x32xf32> to vector<16x16xf32>
    %cst_12 = arith.constant dense<0.000000e+00> : vector<16x16xf32>
    %37 = tpu.matmul %33, %34, %cst_12 {dimension_numbers = #tpu.dot_dimension_numbers<[0], [0], [1], [1], [0, 1, 1, 1], [], []>} : vector<2x16xf32>, vector<2x16xf32>, vector<16x16xf32> -> vector<16x16xf32>
    %cst_13 = arith.constant dense<0xFF800000> : vector<16xf32>
    %38 = vector.multi_reduction <maximumf>, %37, %cst_13 [1] : vector<16x16xf32> to vector<16xf32>
    %39 = vector.shape_cast %38 : vector<16xf32> to vector<16x1xf32>
    %40 = vector.broadcast %39 : vector<16x1xf32> to vector<16x16xf32>
    %41 = arith.subf %37, %40 : vector<16x16xf32>
    %42 = math.exp %41 : vector<16x16xf32>
    %cst_14 = arith.constant dense<0.000000e+00> : vector<16xf32>
    %43 = vector.multi_reduction <add>, %42, %cst_14 [1] : vector<16x16xf32> to vector<16xf32>
    %44 = vector.shape_cast %43 : vector<16xf32> to vector<16x1xf32>
    %45 = tpu.reciprocal %44 {approx = true} : vector<16x1xf32> -> vector<16x1xf32>
    %46 = vector.broadcast %45 : vector<16x1xf32> to vector<16x16xf32>
    %47 = arith.mulf %42, %46 : vector<16x16xf32>
    %cst_15 = arith.constant dense<0.000000e+00> : vector<16x16xf32>
    %48 = tpu.matmul %47, %35, %cst_15 {dimension_numbers = #tpu.dot_dimension_numbers<[1], [0], [0], [1], [0, 0, 1, 1], [], []>} : vector<16x16xf32>, vector<16x16xf32>, vector<16x16xf32> -> vector<16x16xf32>
    %cst_16 = arith.constant dense<0.000000e+00> : vector<16x16xf32>
    %49 = tpu.matmul %4, %48, %cst_16 {dimension_numbers = #tpu.dot_dimension_numbers<[1], [0], [0], [1], [0, 0, 1, 1], [], []>} : vector<16x16xf32>, vector<16x16xf32>, vector<16x16xf32> -> vector<16x16xf32>
    %50 = vector.broadcast %5 : vector<16x1xf32> to vector<16x16xf32>
    %51 = arith.addf %49, %50 : vector<16x16xf32>
    %52 = vector.broadcast %0 : f32 to vector<16x16xf32>
    %53 = arith.mulf %52, %51 : vector<16x16xf32>
    %54 = arith.addf %36, %53 : vector<16x16xf32>
    %55 = tpu.concatenate %32, %54 in 1 : vector<16x16xf32>, vector<16x16xf32> -> vector<16x32xf32>
    %c0_17 = arith.constant 0 : index
    %c0_18 = arith.constant 0 : index
    %56 = vector.load %arg5[%c0_17, %c0_18] : memref<16x32xf32, #tpu.memory_space<vmem>>, vector<16x32xf32>
    tpu.vector_store %arg5[%c0_17, %c0_18], %55 {strides = array<i32>} : memref<16x32xf32, #tpu.memory_space<vmem>>, vector<16x32xf32>,
    %57 = tpu.concatenate %25, %47 in 1 : vector<16x16xf32>, vector<16x16xf32> -> vector<16x32xf32>
    %c0_19 = arith.constant 0 : index
    %c0_20 = arith.constant 0 : index
    %58 = vector.load %arg6[%c0_19, %c0_20] : memref<16x32xf32, #tpu.memory_space<vmem>>, vector<16x32xf32>
    tpu.vector_store %arg6[%c0_19, %c0_20], %57 {strides = array<i32>} : memref<16x32xf32, #tpu.memory_space<vmem>>, vector<16x32xf32>,
    return
  }
  func.func @transform_0(%arg0: i32) -> (i32, i32) {
    %c0_i32 = arith.constant 0 : i32
    %c0_i32_0 = arith.constant 0 : i32
    %c0_i32_1 = arith.constant 0 : i32
    return %c0_i32, %c0_i32_0 : i32, i32
  }
  func.func @transform_1(%arg0: i32) -> (i32, i32) {
    %c0_i32 = arith.constant 0 : i32
    %c0_i32_0 = arith.constant 0 : i32
    %c0_i32_1 = arith.constant 0 : i32
    return %c0_i32, %c0_i32_0 : i32, i32
  }
  func.func @transform_2(%arg0: i32) -> (i32, i32) {
    %c0_i32 = arith.constant 0 : i32
    %c0_i32_0 = arith.constant 0 : i32
    %c0_i32_1 = arith.constant 0 : i32
    return %c0_i32, %c0_i32_0 : i32, i32
  }
  func.func @transform_3(%arg0: i32) -> (i32, i32) {
    %c0_i32 = arith.constant 0 : i32
    %c0_i32_0 = arith.constant 0 : i32
    %c0_i32_1 = arith.constant 0 : i32
    return %c0_i32, %c0_i32_0 : i32, i32
  }
  func.func @transform_4(%arg0: i32) -> (i32, i32) {
    %c0_i32 = arith.constant 0 : i32
    %c0_i32_0 = arith.constant 0 : i32
    %c0_i32_1 = arith.constant 0 : i32
    return %c0_i32, %c0_i32_0 : i32, i32
  }
  func.func @transform_5(%arg0: i32) -> (i32, i32) {
    %c0_i32 = arith.constant 0 : i32
    %c0_i32_0 = arith.constant 0 : i32
    %c0_i32_1 = arith.constant 0 : i32
    return %c0_i32, %c0_i32_0 : i32, i32
  }
}

</mosaic_0001>

<bundles_post_ra>
// kernel: tpu_custom_call.1
= control target key start
LH: loop header
LB: loop body
LE: loop exit
PB: predicated region body
PF: predicated region fallthrough
CT: control target
= control target key end

     0   :  { %12 = vsyncpa [#allocation4], 0  ;;  %s1338_s0 = inlined_call_operand.<no memory space> [shape: f32[1,1], index: 0, kind: input, shape index: {}]   ;;  %s1339_s1 = inlined_call_operand.hbm [shape: f32[17,32], index: 1, kind: input, shape index: {}]   ;;  %s1340_s2 = inlined_call_operand.hbm [shape: f32[20,17], index: 2, kind: input, shape index: {}]   ;;  %s1341_s3 = inlined_call_operand.hbm [shape: f32[16,17], index: 3, kind: input, shape index: {}]   ;;  %s1342_s4 = inlined_call_operand.hbm [shape: f32[16,32], index: 4, kind: output, shape index: {0}]   ;;  %s1343_s5 = inlined_call_operand.hbm [shape: f32[16,32], index: 5, kind: output, shape index: {1}]  }
   0x1   :  { %13 = vsyncpa [#allocation7], 0 }
   0x2   :  { %14 = vsyncpa [#allocation5], 0 }
   0x3   :  { %15 = vsyncpa [#allocation11], 0  ;;  %s1130_s18 = smov [#allocation6]   ;;  %s1131_s20 = smov [#allocation3]  }
   0x4   :  { %s35_s19 = sshll.u32 %s1130_s18, 4  ;;  %s23_s21 = sshll.u32 %s1131_s20, 4  ;;  %s36_s19 = int_to_ptr.vmem [resolvable:$true] %s35_s19  ;;  %s1173_s21 = int_to_ptr.vmem [resolvable:$true] %s23_s21 }
   0x5   :  { %s1012_s24 = scalar_lea.hbm %s1340_s2, 384 }
   0x6   :  { %p1013_p0 = scmp.ne.s32.totalorder %s1340_s2, %s1012_s24  ;;  %p1016_p1 = scmp.lt.u32.totalorder %s1012_s24, %s1340_s2 }
   0x8   :  { %p1018_p2 = pnand %p1016_p1, %p1013_p0 }
   0xa   :  { %1021 = shalt.err (!%p1018_p2)
}
   0xb   :  { %s1022_s29 = scalar_lea.vmem %s36_s19, 384  ;;  %p1027_p4 = scmp.lt.s32.totalorder %s36_s19, %s36_s19 }
   0xc   :  { %p1023_p3 = scmp.ne.s32.totalorder %s36_s19, %s1022_s29  ;;  %p1028_p5 = scmp.lt.s32.totalorder %s1022_s29, %s1022_s29 }
   0xe   :  { %p1029_p6 = por %p1028_p5, %p1027_p4 }
  0x10   :  { %p1030_p7 = pnand %p1029_p6, %p1023_p3 }
  0x12   :  { %1033 = shalt.err (!%p1030_p7)
}
  0x13   :  { %s1132_s30 = smov 128   ;;  %s1133_s6 = smov 8  }
  0x14   :  { %41 = dma.hbm_to_vmem [thread:$0]  %s1340_s2, 384, %s36_s19, [#allocation7], %s1132_s30, %s1132_s30, %s1133_s6  }
  0x15   :  { %s1034_s11 = scalar_lea.hbm %s1339_s1, 384 }
  0x16   :  { %p1035_p8 = scmp.ne.s32.totalorder %s1339_s1, %s1034_s11  ;;  %p1038_p9 = scmp.lt.u32.totalorder %s1034_s11, %s1339_s1 }
  0x18   :  { %p1040_p10 = pnand %p1038_p9, %p1035_p8 }
  0x1a   :  { %1043 = shalt.err (!%p1040_p10)
}
  0x1b   :  { %s1044_s16 = scalar_lea.vmem %s1173_s21, 384  ;;  %p1049_p12 = scmp.lt.s32.totalorder %s1173_s21, %s1173_s21 }
  0x1c   :  { %p1045_p11 = scmp.ne.s32.totalorder %s1173_s21, %s1044_s16  ;;  %p1050_p13 = scmp.lt.s32.totalorder %s1044_s16, %s1044_s16 }
  0x1e   :  { %p1051_p0 = por %p1050_p13, %p1049_p12 }
  0x20   :  { %p1052_p1 = pnand %p1051_p0, %p1045_p11 }
  0x22   :  { %1055 = shalt.err (!%p1052_p1)
}
  0x23   :  { %29 = dma.hbm_to_vmem [thread:$0]  %s1339_s1, 384, %s1173_s21, [#allocation4], %s1132_s30, %s1132_s30, %s1133_s6  }
  0x24   :  { %s1134_s18 = smov [#allocation8]   ;;  %s1056_s23 = scalar_lea.hbm %s1341_s3, 256 }
  0x25   :  { %s47_s19 = sshll.u32 %s1134_s18, 4  ;;  %p1057_p2 = scmp.ne.s32.totalorder %s1341_s3, %s1056_s23  ;;  %s48_s19 = int_to_ptr.vmem [resolvable:$true] %s47_s19 }
  0x26   :  { %p1060_p3 = scmp.lt.u32.totalorder %s1056_s23, %s1341_s3 }
  0x28   :  { %p1062_p4 = pnand %p1060_p3, %p1057_p2 }
  0x2a   :  { %1065 = shalt.err (!%p1062_p4)
}
  0x2b   :  { %s1066_s28 = scalar_lea.vmem %s48_s19, 256  ;;  %p1071_p6 = scmp.lt.s32.totalorder %s48_s19, %s48_s19 }
  0x2c   :  { %p1067_p5 = scmp.ne.s32.totalorder %s48_s19, %s1066_s28  ;;  %p1072_p7 = scmp.lt.s32.totalorder %s1066_s28, %s1066_s28 }
  0x2e   :  { %p1073_p8 = por %p1072_p7, %p1071_p6 }
  0x30   :  { %p1074_p9 = pnand %p1073_p8, %p1067_p5 }
  0x32   :  { %1077 = shalt.err (!%p1074_p9)
}
  0x33   :  { %53 = dma.hbm_to_vmem [thread:$0]  %s1341_s3, 256, %s48_s19, [#allocation7], %s1132_s30, %s1132_s30, %s1133_s6  }
  0x34   :  { %1122 = dma.done.wait [#allocation4], 384  }
  0x35   :  { %1123 = vsyncadd [#allocation4], 4294966912 }
  0x36   :  { %1124 = dma.done.wait [#allocation7], 640  }
  0x37   :  { %1125 = vsyncadd [#allocation7], 4294966656  ;;  %v1135_v0 = vmov 0.0|0.0   ;;  %vm1136_vm0 = vmmov 0   ;;  %v1137_v1 = vmov 0.0   ;;  %v1226_v2 = vld [vmem:[#allocation3] sm:$0xff] }
  0x38   :  { %957 = vmatprep.subr.bf16.mxu0 %v1135_v0  ;;  %910 = vmatprep.mubr.msk.f32.mxu0 %vm1136_vm0, %v1137_v1  ;;  %v1228_v3 = vld [vmem:[#allocation3 + $0x8] sm:$0xff]  ;;  %v66_v5 = vld [vmem:[#allocation3 + $0x10] sm:$0x1]  ;;  %vm82_vm1 = vcmask 1040384   ;;  %v67_v6 = vld [vmem:[#allocation6] sm:$0xff]  ;;  %vm72_vm2 = vcmask 138240  }
  0x39   :  { %v958_v4 = vpack.c.bf16 %v1228_v3, %v1226_v2  ;;  %v68_v7 = vld [vmem:[#allocation6 + $0x8] sm:$0xff]  ;;  %v69_v8 = vld [vmem:[#allocation6 + $0x10] sm:$0xf]  ;;  %vm207_vm3 = vcmask 1041408   ;;  %vm310_vm4 = vcmask 1043456   ;;  %vm200_vm5 = vcmask 15360  }
  0x3a   :  { %vm285_vm6 = vcmask 130048   ;;  %s1138_s3 = smov 112   ;;  %v70_v46 = vld [vmem:[#allocation8] sm:$0xff]  ;;  %v1139_v47 = vmov 16   ;;  %v71_v53 = vld [vmem:[#allocation8 + $0x8] sm:$0xff]  ;;  %s1140_s29 = smov 16  }
  0x3b   :  { %959 = vmatpush3.bf16.msra.mxu0 %v958_v4  ;;  %vm811_vm7 = vcmask 261120   ;;  %s1142_s10 = smov [#allocation10]  }
  0x3c   :  { %908 = vmatprep.subr.mxu0 %v1137_v1  ;;  %s841_s11 = sshll.u32 %s1142_s10, 4  ;;  %s1298_s11 = int_to_ptr.vmem [resolvable:$true] %s841_s11 }
  0x3f   :  { %909 = vmatpush3.msk.msra.mxu0 %vm82_vm1, %v66_v5 }
  0x40   :  { %911 = vmatmul.mubr.msk.f32.vlgmr.msra.gmra.mrb[0].mxu0 %vm72_vm2, %v67_v6 }
  0x41   :  { %913 = vmatprep.mubr.msk.f32.mxu0 %vm1136_vm0, %v1137_v1 }
  0x44   :  { %914 = vmatmul.mubr.msk.f32.gmra.mrb[2].mxu0 %vm72_vm2, %v68_v7 }
  0x45   :  { %916 = vmatprep.mubr.msk.f32.mxu0 %vm1136_vm0, %v1137_v1 }
  0x48   :  { %917 = vmatmul.mubr.msk.f32.gmra.mrb[4].mxu0 %vm72_vm2, %v69_v8 }
 0x113   :  { %v152_v9 = vpop.f32.mrb[0].mxu0 }
 0x114   :  { %166 = vxpose.xlu0.b32.start.end [1/1] (short) (narrow) %v152_v9, 16  ;;  %v912_v10 = vpop.f32.mrb[1].mxu0  ;;  %v199_v11 = vrot.slane %v152_v9, 2  ;;  %v311_v13 = vrot.slane %v152_v9, 4 }
 0x116   :  { %919 = vmatprep.subr.msk.mxu1 %vm207_vm3, %v199_v11 }
 0x117   :  { %v157_v12 = vpop.f32.mrb[2].mxu0  ;;  %920 = vmatpush3.msk.msra.mxu1 %vm207_vm3, %v199_v11 }
 0x118   :  { %v312_v14 = vrot.slane %v157_v12, 4  ;;  %v915_v15 = vpop.f32.mrb[3].mxu0 }
 0x11a   :  { %v1236_v16 = vsel %vm310_vm4, %v311_v13, %v312_v14 }
 0x11b   :  { %v162_v17 = vpop.f32.mrb[4].mxu0 }
 0x11c   :  { %v314_v18 = vrot.slane %v162_v17, 4  ;;  %v918_v19 = vpop.f32.mrb[5].mxu0 }
 0x11e   :  { %v1238_v20 = vsel %vm310_vm4, %v312_v14, %v314_v18 }
 0x11f   :  { %v960_v21 = vpack.c.bf16 %v1238_v20, %v1236_v16  ;;  %v989_v22 = vpack.i.bf16 %v1238_v20, %v1236_v16 }
 0x121   :  { %961 = vmatprep.subr.bf16.mxu1 %v960_v21 }
 0x13d   :  { %995 = vset.pattern.permute.xlu0 %v1139_v47 }
 0x194   :  { %v182_v23 = vpop.trf.xlu0 }
 0x195   :  { %921 = vmatprep.mubr.msk.f32.mxu1 %vm200_vm5, %v182_v23 }
 0x198   :  { %v183_v24 = vpop.trf.xlu0 }
 0x199   :  { %922 = vmatmul.mubr.msk.f32.vlgmr.msra.gmra.mrb[0].mxu1 %vm200_vm5, %v183_v24 }
 0x19a   :  { %963 = vmatpush3.bf16.msra.mxu1 %v960_v21 }
 0x26c   :  { %v923_v25 = vpop.f32.mrb[0].mxu1 }
 0x26d   :  { %v276_v26 = vpop.f32.mrb[1].mxu1  ;;  %v289_v27 = vsel %vm285_vm6, %v923_v25, -inf }
 0x26e   :  { %290 = vmax.xlane.f32.xlu1 %v289_v27  ;;  %v286_v28 = vsel %vm285_vm6, %v276_v26, -inf }
 0x26f   :  { %287 = vmax.xlane.f32.xlu0 %v286_v28 }
 0x2fb   :  { %v291_v29 = vpop.xlane.xlu1 %290 }
 0x2fc   :  { %v293_v30 = vsub.f32 %v923_v25, %v291_v29  ;;  %v288_v31 = vpop.xlane.xlu0 %287  ;;  %v488_v29 = vstv %s1338_s0  ;;  %s1141_s0 = smov [#allocation9]  }
 0x2fd   :  { %v292_v32 = vsub.f32 %v276_v26, %v288_v31  ;;  %s829_s9 = sshll.u32 %s1141_s0, 4  ;;  %s830_s9 = int_to_ptr.vmem [resolvable:$true] %s829_s9 }
 0x2fe   :  { %v296_v33 = vmul.f32 1.442695, %v293_v30  ;;  %s1078_s12 = scalar_lea.vmem %s830_s9, 256  ;;  %p1083_p11 = scmp.lt.s32.totalorder %s830_s9, %s830_s9 }
 0x2ff   :  { %v294_v34 = vmul.f32 1.442695, %v292_v32  ;;  %p1079_p10 = scmp.ne.s32.totalorder %s830_s9, %s1078_s12  ;;  %p1084_p12 = scmp.lt.s32.totalorder %s1078_s12, %s1078_s12 }
 0x301   :  { %996 = vpow2.f32 %v294_v34  ;;  %p1085_p13 = por %p1084_p12, %p1083_p11 }
 0x302   :  { %998 = vpow2.f32 %v296_v33 }
 0x303   :  { %p1086_p0 = pnand %p1085_p13, %p1079_p10 }
 0x30b   :  { %v997_v35 = vpop.eup %996 }
 0x30c   :  { %v298_v36 = vsel %vm285_vm6, %v997_v35, 0.0  ;;  %v999_v37 = vpop.eup %998 }
 0x30d   :  { %299 = vadd.xlane.f32.xlu1 %v298_v36  ;;  %v301_v38 = vsel %vm285_vm6, %v999_v37, 0.0 }
 0x311   :  { %302 = vadd.xlane.f32.xlu1 %v301_v38 }
 0x322   :  { %493 = vrot.lane.b32.xlu1 %v152_v9, %s1138_s3 }
 0x326   :  { %528 = vrot.lane.b32.xlu1 %v199_v11, %s1138_s3 }
 0x39a   :  { %v300_v39 = vpop.xlane.xlu1 %299 }
 0x39b   :  { %1000 = vrcp.f32 %v300_v39 }
 0x39e   :  { %v303_v40 = vpop.xlane.xlu1 %302 }
 0x39f   :  { %1002 = vrcp.f32 %v303_v40 }
 0x3a2   :  { %v494_v41 = vpop.permute.xlu1 %493 }
 0x3a3   :  { %496 = vxpose.xlu1.b32.start.end [1/1] (short) (narrow) %v494_v41, 16 }
 0x3a5   :  { %v1001_v42 = vpop.eup %1000 }
 0x3a6   :  { %v1252_v43 = vmul.f32 %v1001_v42, %v997_v35  ;;  %v529_v48 = vpop.permute.xlu1 %528 }
 0x3a8   :  { %928 = vmatprep.mubr.msk.f32.mxu1 %vm285_vm6, %v1252_v43 }
 0x3a9   :  { %v1003_v44 = vpop.eup %1002 }
 0x3aa   :  { %v1256_v45 = vmul.f32 %v1003_v44, %v999_v37 }
 0x3ac   :  { %929 = vmatmul.mubr.msk.f32.vlgmr.msra.gmra.mrb[2].mxu1 %vm285_vm6, %v1256_v45 }
 0x3ad   :  { %935 = vmatprep.mubr.msk.f32.mxu1 %vm285_vm6, %v70_v46 }
 0x3c1   :  { %994 = vset.pattern.permute.xlu1 %v1139_v47 }
 0x3c5   :  { %401 = vperm.xlu1 %994, %v70_v46  }
 0x423   :  { %v512_v52 = vpop.trf.xlu1 }
 0x427   :  { %v513_v54 = vpop.trf.xlu1 }
 0x444   :  { %v402_v16 = vpop.permute.xlu1 %401 }
 0x47f   :  { %v930_v49 = vpop.f32.mrb[2].mxu1 }
 0x480   :  { %v390_v50 = vpop.f32.mrb[3].mxu1 }
 0x481   :  { %v964_v51 = vpack.c.bf16 %v930_v49, %v390_v50 }
 0x483   :  { %965 = vmatprep.subr.bf16.mxu1 %v964_v51 }
 0x484   :  { %967 = vmatpush3.bf16.msra.mxu1 %v964_v51 }
 0x485   :  { %938 = vmatprep.subr.msk.mxu1 %vm207_vm3, %v529_v48 }
 0x487   :  { %936 = vmatmul.mubr.msk.f32.vlgmr.msra.gmra.mrb[4].mxu1 %vm285_vm6, %v71_v53 }
 0x488   :  { %939 = vmatpush3.msk.msra.mxu1 %vm207_vm3, %v529_v48  ;;  %940 = vmatprep.mubr.msk.f32.mxu1 %vm200_vm5, %v512_v52 }
 0x48b   :  { %941 = vmatmul.mubr.msk.f32.vlgmr.msra.gmra.mrb[6].mxu1 %vm200_vm5, %v513_v54 }
 0x48c   :  { %954 = vmatprep.mubr.msk.f32.mxu1 %vm285_vm6, %v70_v46 }
 0x55a   :  { %v1267_v55 = vpop.f32.mrb[4].mxu1 }
 0x55b   :  { %v1269_v56 = vpop.f32.mrb[5].mxu1 }
 0x55c   :  { %v480_v34 = vadd.f32 %v1269_v56, %v402_v16 }
 0x55e   :  { %v942_v57 = vpop.f32.mrb[6].mxu1  ;;  %v489_v37 = vmul.f32 %v488_v29, %v480_v34 }
 0x55f   :  { %v604_v58 = vpop.f32.mrb[7].mxu1  ;;  %v616_v60 = vsel %vm285_vm6, %v942_v57, -inf }
 0x560   :  { %v613_v59 = vsel %vm285_vm6, %v604_v58, -inf  ;;  %v491_v42 = vadd.f32 %v489_v37, %v1226_v2 }
 0x561   :  { %614 = vmax.xlane.f32.xlu0 %v613_v59 }
 0x565   :  { %617 = vmax.xlane.f32.xlu0 %v616_v60 }
 0x5ee   :  { %v615_v61 = vpop.xlane.xlu0 %614 }
 0x5ef   :  { %v619_v62 = vsub.f32 %v604_v58, %v615_v61 }
 0x5f1   :  { %v621_v1 = vmul.f32 1.442695, %v619_v62 }
 0x5f2   :  { %v618_v63 = vpop.xlane.xlu0 %617 }
 0x5f3   :  { %v620_v0 = vsub.f32 %v942_v57, %v618_v63 }
 0x5f5   :  { %v623_v4 = vmul.f32 1.442695, %v620_v0 }
 0x5f7   :  { %1004 = vpow2.f32 %v623_v4 }
 0x5f8   :  { %1006 = vpow2.f32 %v621_v1 }
 0x601   :  { %v1005_v5 = vpop.eup %1004 }
 0x602   :  { %v628_v6 = vsel %vm285_vm6, %v1005_v5, 0.0  ;;  %v1007_v7 = vpop.eup %1006 }
 0x603   :  { %629 = vadd.xlane.f32.xlu0 %v628_v6  ;;  %v625_v8 = vsel %vm285_vm6, %v1007_v7, 0.0 }
 0x607   :  { %626 = vadd.xlane.f32.xlu0 %v625_v8 }
 0x61d   :  { %990 = vrot.lane.b32.xlu0 %v989_v22, %s1138_s3 }
 0x621   :  { %406 = vperm.xlu0 %995, %v71_v53  }
 0x690   :  { %v630_v9 = vpop.xlane.xlu0 %629 }
 0x691   :  { %1008 = vrcp.f32 %v630_v9 }
 0x694   :  { %v627_v10 = vpop.xlane.xlu0 %626 }
 0x695   :  { %1010 = vrcp.f32 %v627_v10 }
 0x698   :  { %v991_v11 = vpop.permute.xlu0 %990 }
 0x699   :  { %v993_v12 = vunpack.i.h.bf16 %v991_v11  ;;  %v992_v13 = vunpack.i.l.bf16 %v991_v11 }
 0x69b   :  { %v1009_v14 = vpop.eup %1008  ;;  %v968_v15 = vpack.c.bf16 %v993_v12, %v992_v13 }
 0x69c   :  { %v634_v17 = vmul.f32 %v1009_v14, %v1005_v5 }
 0x69d   :  { %969 = vmatprep.subr.bf16.mxu0 %v968_v15 }
 0x69e   :  { %816 = vrot.lane.b32.xlu1 %v634_v17, %s1140_s29  ;;  %971 = vmatpush3.bf16.msra.mxu0 %v968_v15 }
 0x69f   :  { %v1011_v18 = vpop.eup %1010 }
 0x6a0   :  { %v633_v19 = vmul.f32 %v1011_v18, %v1007_v7  ;;  %v407_v25 = vpop.permute.xlu0 %406 }
 0x6a1   :  { %v485_v33 = vadd.f32 %v1267_v55, %v407_v25 }
 0x6a2   :  { %947 = vmatprep.mubr.msk.f32.mxu0 %vm285_vm6, %v633_v19 }
 0x6a3   :  { %948 = vmatmul.mubr.msk.f32.vlgmr.msra.gmra.mrb[6].mxu0 %vm285_vm6, %v634_v17  ;;  %v490_v35 = vmul.f32 %v488_v29, %v485_v33 }
 0x6a5   :  { %v492_v38 = vadd.f32 %v490_v35, %v1228_v3 }
 0x710   :  { %v817_v20 = vpop.permute.xlu1 %816 }
 0x711   :  { %v821_v21 = vsel %vm285_vm6, %v1256_v45, %v817_v20 }
 0x712   :  { %823 = vst.msk [vmem:[#allocation10 + $0x8] sm:$0xff] %vm811_vm7, %v821_v21 }
 0x776   :  { %v949_v22 = vpop.f32.mrb[6].mxu0 }
 0x777   :  { %v713_v23 = vpop.f32.mrb[7].mxu0 }
 0x778   :  { %v972_v24 = vpack.c.bf16 %v949_v22, %v713_v23 }
 0x77a   :  { %973 = vmatprep.subr.bf16.mxu1 %v972_v24 }
 0x77b   :  { %975 = vmatpush3.bf16.msra.mxu1 %v972_v24 }
 0x77e   :  { %955 = vmatmul.mubr.msk.f32.vlgmr.msra.gmra.mrb[8].mxu1 %vm285_vm6, %v71_v53 }
 0x851   :  { %v956_v26 = vpop.f32.mrb[8].mxu1 }
 0x852   :  { %v794_v27 = vadd.f32 %v956_v26, %v407_v25  ;;  %v788_v28 = vpop.f32.mrb[9].mxu1 }
 0x853   :  { %v789_v31 = vadd.f32 %v788_v28, %v402_v16 }
 0x854   :  { %v798_v30 = vmul.f32 %v794_v27, %v488_v29 }
 0x855   :  { %v797_v32 = vmul.f32 %v789_v31, %v488_v29 }
 0x856   :  { %803 = vrot.lane.b32.xlu0 %v798_v30, %s1140_s29 }
 0x85a   :  { %801 = vrot.lane.b32.xlu0 %v797_v32, %s1140_s29 }
 0x85e   :  { %814 = vrot.lane.b32.xlu0 %v633_v19, %s1140_s29 }
 0x8c8   :  { %v804_v36 = vpop.permute.xlu0 %803 }
 0x8c9   :  { %v808_v39 = vadd.f32 %v804_v36, %v1228_v3 }
 0x8cb   :  { %v810_v40 = vsel %vm285_vm6, %v492_v38, %v808_v39 }
 0x8cc   :  { %v802_v41 = vpop.permute.xlu0 %801  ;;  %813 = vst.msk [vmem:[#allocation9 + $0x8] sm:$0xff] %vm811_vm7, %v810_v40 }
 0x8cd   :  { %v807_v44 = vadd.f32 %v802_v41, %v1226_v2 }
 0x8cf   :  { %v809_v45 = vsel %vm285_vm6, %v491_v42, %v807_v44 }
 0x8d0   :  { %v815_v46 = vpop.permute.xlu0 %814  ;;  %812 = vst.msk [vmem:[#allocation9] sm:$0xff] %vm811_vm7, %v809_v45 }
 0x8d1   :  { %v820_v3 = vsel %vm285_vm6, %v1252_v43, %v815_v46 }
 0x8d2   :  { %1089 = shalt.err (!%p1086_p0)
}
 0x8d3   :  { %s1090_s15 = scalar_lea.hbm %s1342_s4, 256 }
 0x8d4   :  { %p1091_p1 = scmp.ne.s32.totalorder %s1342_s4, %s1090_s15  ;;  %p1094_p2 = scmp.lt.u32.totalorder %s1090_s15, %s1342_s4 }
 0x8d6   :  { %p1096_p3 = pnand %p1094_p2, %p1091_p1 }
 0x8d8   :  { %1099 = shalt.err (!%p1096_p3)
}
 0x8d9   :  { %835 = dma.vmem_to_hbm [thread:$0]  %s830_s9, 256, %s1342_s4, [#allocation5], %s1132_s30, %s1132_s30, %s1133_s6   ;;  %822 = vst.msk [vmem:[#allocation10] sm:$0xff] %vm811_vm7, %v820_v3 }
 0x8da   :  { %s1100_s22 = scalar_lea.vmem %s1298_s11, 256  ;;  %p1105_p5 = scmp.lt.s32.totalorder %s1298_s11, %s1298_s11 }
 0x8db   :  { %p1101_p4 = scmp.ne.s32.totalorder %s1298_s11, %s1100_s22  ;;  %p1106_p6 = scmp.lt.s32.totalorder %s1100_s22, %s1100_s22 }
 0x8dd   :  { %p1107_p7 = por %p1106_p6, %p1105_p5 }
 0x8df   :  { %p1108_p8 = pnand %p1107_p7, %p1101_p4 }
 0x8e1   :  { %1111 = shalt.err (!%p1108_p8)
}
 0x8e2   :  { %s1112_s25 = scalar_lea.hbm %s1343_s5, 256 }
 0x8e3   :  { %p1113_p9 = scmp.ne.s32.totalorder %s1343_s5, %s1112_s25  ;;  %p1116_p10 = scmp.lt.u32.totalorder %s1112_s25, %s1343_s5 }
 0x8e5   :  { %p1118_p11 = pnand %p1116_p10, %p1113_p9 }
 0x8e7   :  { %1121 = shalt.err (!%p1118_p11)
}
 0x8e8   :  { %847 = dma.vmem_to_hbm [thread:$0]  %s1298_s11, 256, %s1343_s5, [#allocation11], %s1132_s30, %s1132_s30, %s1133_s6  }
 0x8e9   :  { %1126 = dma.done.wait [#allocation5], 256  }
 0x8ea   :  { %1127 = vsyncadd [#allocation5], 4294967040 }
 0x8eb   :  { %1128 = dma.done.wait [#allocation11], 256  }
 0x8ec   :  { %1129 = vsyncadd [#allocation11], 4294967040 }
 0x8ed   :  { %854 = vsyncpa [#allocation4], 1 }
 0x8ee   :  { %855 = vsyncpa [#allocation7], 1 }
 0x8ef   :  { %856 = vsyncpa [#allocation5], 1 }
 0x8f0   :  { %857 = vsyncpa [#allocation11], 1 }

</bundles_post_ra>
